<compile_context>
chip_gen: v7x
topology: tpu7x:2x2x1
jax: 0.10.0
libtpu: 0.0.40
codegen_flags: <defaults>
</compile_context>

<pallas_src>
import functools

import jax
import jax.numpy as jnp
from jax.experimental import pallas as pl
from jax.experimental.pallas import tpu as pltpu

HIDDEN = 128
LANES = 128


def _round_up(x, m):
    return ((x + m - 1) // m) * m


def dqn_kernel(x_ref, w1_ref, b1_ref, w2_ref, b2_ref, w3_ref, b3_ref, out_ref):
    # layer1 + ReLU  (bf16 MXU inputs, f32 accumulate)
    h1 = jnp.dot(x_ref[...], w1_ref[...], preferred_element_type=jnp.float32)
    h1 = jnp.maximum(h1 + b1_ref[...], 0.0).astype(jnp.bfloat16)
    # layer2 + ReLU
    h2 = jnp.dot(h1, w2_ref[...], preferred_element_type=jnp.float32)
    h2 = jnp.maximum(h2 + b2_ref[...], 0.0).astype(jnp.bfloat16)
    # layer3 (no activation); output block is lane-dense (128 wide)
    h3 = jnp.dot(h2, w3_ref[...], preferred_element_type=jnp.float32)
    out_ref[...] = (h3 + b3_ref[...]).astype(out_ref.dtype)


@functools.partial(jax.jit, static_argnames=("tb",))
def dqn_forward(x, params, tb=1024):
    w1, b1, w2, b2, w3, b3 = params
    B, n_obs = x.shape
    n_actions = w3.shape[1]

    # ---- layout plumbing (all outside the kernel) ----
    k_pad = _round_up(n_obs, 8)           # sublane-aligned K for x / w1
    n_pad = _round_up(n_actions, LANES)   # lane-dense output width

    # Batch tile: divisible by 8, batch padded to a multiple of the tile.
    bp = _round_up(B, 8)
    TB = min(tb, bp)
    bp = _round_up(bp, TB)

    x_p = jnp.zeros((bp, k_pad), jnp.bfloat16).at[:B, :n_obs].set(
        x.astype(jnp.bfloat16))
    w1_p = jnp.zeros((k_pad, HIDDEN), jnp.bfloat16).at[:n_obs, :].set(
        w1.astype(jnp.bfloat16))
    w2_p = w2.astype(jnp.bfloat16)
    w3_p = jnp.zeros((HIDDEN, n_pad), jnp.bfloat16).at[:, :n_actions].set(
        w3.astype(jnp.bfloat16))
    b1_p = b1.astype(jnp.float32)
    b2_p = b2.astype(jnp.float32)
    b3_p = jnp.zeros((1, n_pad), jnp.float32).at[:, :n_actions].set(
        b3.astype(jnp.float32))

    grid = (pl.cdiv(bp, TB),)

    flops = 2 * bp * (k_pad * HIDDEN + HIDDEN * HIDDEN + HIDDEN * n_pad)
    bytes_accessed = (
        x_p.size * 2 + w1_p.size * 2 + w2_p.size * 2 + w3_p.size * 2
        + (b1_p.size + b2_p.size + b3_p.size) * 4
        + bp * n_pad * 4)

    out_padded = pl.pallas_call(
        dqn_kernel,
        out_shape=jax.ShapeDtypeStruct((bp, n_pad), jnp.float32),
        grid=grid,
        in_specs=[
            pl.BlockSpec((TB, k_pad), lambda i: (i, 0)),        # x: tiled over batch
            pl.BlockSpec((k_pad, HIDDEN), lambda i: (0, 0)),    # w1: VMEM-resident
            pl.BlockSpec((1, HIDDEN), lambda i: (0, 0)),        # b1
            pl.BlockSpec((HIDDEN, HIDDEN), lambda i: (0, 0)),   # w2
            pl.BlockSpec((1, HIDDEN), lambda i: (0, 0)),        # b2
            pl.BlockSpec((HIDDEN, n_pad), lambda i: (0, 0)),    # w3 (lane-padded)
            pl.BlockSpec((1, n_pad), lambda i: (0, 0)),         # b3 (lane-padded)
        ],
        out_specs=pl.BlockSpec((TB, n_pad), lambda i: (i, 0)),
        compiler_params=pltpu.CompilerParams(
            dimension_semantics=("parallel",),
            vmem_limit_bytes=64 * 1024 * 1024,
        ),
        cost_estimate=pl.CostEstimate(
            flops=flops, transcendentals=0, bytes_accessed=bytes_accessed),
    )(x_p, w1_p, b1_p, w2_p, b2_p, w3_p, b3_p)

    return out_padded[:B, :n_actions]


def init_params(key, n_observations, n_actions, hidden=HIDDEN):
    # Deterministic init mimicking PyTorch Linear default (uniform +/- 1/sqrt(fan_in)).
    ks = jax.random.split(key, 6)

    def lin(kw, kb, fan_in, fan_out):
        bound = 1.0 / jnp.sqrt(fan_in)
        w = jax.random.uniform(kw, (fan_in, fan_out), jnp.float32, -bound, bound)
        b = jax.random.uniform(kb, (1, fan_out), jnp.float32, -bound, bound)
        return w, b

    w1, b1 = lin(ks[0], ks[1], n_observations, hidden)
    w2, b2 = lin(ks[2], ks[3], hidden, hidden)
    w3, b3 = lin(ks[4], ks[5], hidden, n_actions)
    return (w1, b1, w2, b2, w3, b3)


def dqn_reference_f32(x, params):
    w1, b1, w2, b2, w3, b3 = params
    h1 = jnp.maximum(x @ w1 + b1, 0.0)
    h2 = jnp.maximum(h1 @ w2 + b2, 0.0)
    return h2 @ w3 + b3


def dqn_reference_bf16(x, params):
    # Same precision recipe as the kernel: bf16 inputs/weights, f32 accumulation.
    w1, b1, w2, b2, w3, b3 = params
    xb = x.astype(jnp.bfloat16)
    w1b, w2b, w3b = (w.astype(jnp.bfloat16) for w in (w1, w2, w3))
    h1 = jnp.maximum(
        jnp.dot(xb, w1b, preferred_element_type=jnp.float32) + b1, 0.0
    ).astype(jnp.bfloat16)
    h2 = jnp.maximum(
        jnp.dot(h1, w2b, preferred_element_type=jnp.float32) + b2, 0.0
    ).astype(jnp.bfloat16)
    return jnp.dot(h2, w3b, preferred_element_type=jnp.float32) + b3


if __name__ == "__main__":
    key = jax.random.PRNGKey(0)
    n_observations, n_actions, batch = 4, 2, 2
    kp, kx = jax.random.split(key)
    params = init_params(kp, n_observations, n_actions)
    x = jax.random.normal(kx, (batch, n_observations), jnp.float32)

    out = dqn_forward(x, params)
    jax.block_until_ready(out)

    assert out.shape == (batch, n_actions)
    ref_bf16 = dqn_reference_bf16(x, params)
    ref_f32 = dqn_reference_f32(x, params)
    assert jnp.allclose(out, ref_bf16, atol=1e-2, rtol=1e-2), "mismatch vs bf16 reference"
    assert jnp.allclose(out, ref_f32, atol=5e-2, rtol=5e-2), "mismatch vs f32 reference"
    print("KERNEL_OK")
</pallas_src>

<mosaic_0001>
module attributes {stable_mosaic.version = 11 : i64} {
  func.func @dqn_kernel(%arg0: i32, %arg1: memref<8x8xbf16, #tpu.memory_space<vmem>>, %arg2: memref<8x128xbf16, #tpu.memory_space<vmem>>, %arg3: memref<1x128xf32, #tpu.memory_space<vmem>>, %arg4: memref<128x128xbf16, #tpu.memory_space<vmem>>, %arg5: memref<1x128xf32, #tpu.memory_space<vmem>>, %arg6: memref<128x128xbf16, #tpu.memory_space<vmem>>, %arg7: memref<1x128xf32, #tpu.memory_space<vmem>>, %arg8: memref<8x128xf32, #tpu.memory_space<vmem>>) attributes {dimension_semantics = [#tpu.dimension_semantics<parallel>], iteration_bounds = array<i64: 1>, scalar_prefetch = 0 : i64, scratch_operands = 0 : i64, tpu.core_type = #tpu.core_type<tc>, window_params = [{transform_indices = @transform_0, window_bounds = array<i64: 8, 8>}, {pipeline_mode = #tpu.pipeline_mode<synchronous>, transform_indices = @transform_1, window_bounds = array<i64: 8, 128>}, {pipeline_mode = #tpu.pipeline_mode<synchronous>, transform_indices = @transform_2, window_bounds = array<i64: 1, 128>}, {pipeline_mode = #tpu.pipeline_mode<synchronous>, transform_indices = @transform_3, window_bounds = array<i64: 128, 128>}, {pipeline_mode = #tpu.pipeline_mode<synchronous>, transform_indices = @transform_4, window_bounds = array<i64: 1, 128>}, {pipeline_mode = #tpu.pipeline_mode<synchronous>, transform_indices = @transform_5, window_bounds = array<i64: 128, 128>}, {pipeline_mode = #tpu.pipeline_mode<synchronous>, transform_indices = @transform_6, window_bounds = array<i64: 1, 128>}, {transform_indices = @transform_7, window_bounds = array<i64: 8, 128>}]} {
    %c0 = arith.constant 0 : index
    %c0_0 = arith.constant 0 : index
    %0 = vector.load %arg1[%c0, %c0_0] : memref<8x8xbf16, #tpu.memory_space<vmem>>, vector<8x8xbf16>
    %c0_1 = arith.constant 0 : index
    %c0_2 = arith.constant 0 : index
    %1 = vector.load %arg2[%c0_1, %c0_2] : memref<8x128xbf16, #tpu.memory_space<vmem>>, vector<8x128xbf16>
    %cst = arith.constant dense<0.000000e+00> : vector<8x128xf32>
    %2 = tpu.matmul %0, %1, %cst {dimension_numbers = #tpu.dot_dimension_numbers<[1], [0], [0], [1], [0, 0, 1, 1], [], []>} : vector<8x8xbf16>, vector<8x128xbf16>, vector<8x128xf32> -> vector<8x128xf32>
    %c0_3 = arith.constant 0 : index
    %c0_4 = arith.constant 0 : index
    %3 = vector.load %arg3[%c0_3, %c0_4] : memref<1x128xf32, #tpu.memory_space<vmem>>, vector<1x128xf32>
    %4 = vector.broadcast %3 : vector<1x128xf32> to vector<8x128xf32>
    %5 = arith.addf %2, %4 : vector<8x128xf32>
    %cst_5 = arith.constant 0.000000e+00 : f32
    %6 = vector.broadcast %cst_5 : f32 to vector<8x128xf32>
    %7 = arith.maximumf %5, %6 : vector<8x128xf32>
    %8 = arith.truncf %7 : vector<8x128xf32> to vector<8x128xbf16>
    %c0_6 = arith.constant 0 : index
    %c0_7 = arith.constant 0 : index
    %9 = vector.load %arg4[%c0_6, %c0_7] : memref<128x128xbf16, #tpu.memory_space<vmem>>, vector<128x128xbf16>
    %cst_8 = arith.constant dense<0.000000e+00> : vector<8x128xf32>
    %10 = tpu.matmul %8, %9, %cst_8 {dimension_numbers = #tpu.dot_dimension_numbers<[1], [0], [0], [1], [0, 0, 1, 1], [], []>} : vector<8x128xbf16>, vector<128x128xbf16>, vector<8x128xf32> -> vector<8x128xf32>
    %c0_9 = arith.constant 0 : index
    %c0_10 = arith.constant 0 : index
    %11 = vector.load %arg5[%c0_9, %c0_10] : memref<1x128xf32, #tpu.memory_space<vmem>>, vector<1x128xf32>
    %12 = vector.broadcast %11 : vector<1x128xf32> to vector<8x128xf32>
    %13 = arith.addf %10, %12 : vector<8x128xf32>
    %cst_11 = arith.constant 0.000000e+00 : f32
    %14 = vector.broadcast %cst_11 : f32 to vector<8x128xf32>
    %15 = arith.maximumf %13, %14 : vector<8x128xf32>
    %16 = arith.truncf %15 : vector<8x128xf32> to vector<8x128xbf16>
    %c0_12 = arith.constant 0 : index
    %c0_13 = arith.constant 0 : index
    %17 = vector.load %arg6[%c0_12, %c0_13] : memref<128x128xbf16, #tpu.memory_space<vmem>>, vector<128x128xbf16>
    %cst_14 = arith.constant dense<0.000000e+00> : vector<8x128xf32>
    %18 = tpu.matmul %16, %17, %cst_14 {dimension_numbers = #tpu.dot_dimension_numbers<[1], [0], [0], [1], [0, 0, 1, 1], [], []>} : vector<8x128xbf16>, vector<128x128xbf16>, vector<8x128xf32> -> vector<8x128xf32>
    %c0_15 = arith.constant 0 : index
    %c0_16 = arith.constant 0 : index
    %19 = vector.load %arg7[%c0_15, %c0_16] : memref<1x128xf32, #tpu.memory_space<vmem>>, vector<1x128xf32>
    %20 = vector.broadcast %19 : vector<1x128xf32> to vector<8x128xf32>
    %21 = arith.addf %18, %20 : vector<8x128xf32>
    %c0_17 = arith.constant 0 : index
    %c0_18 = arith.constant 0 : index
    %22 = vector.load %arg8[%c0_17, %c0_18] : memref<8x128xf32, #tpu.memory_space<vmem>>, vector<8x128xf32>
    tpu.vector_store %arg8[%c0_17, %c0_18], %21 {strides = array<i32>} : memref<8x128xf32, #tpu.memory_space<vmem>>, vector<8x128xf32>,
    return
  }
  func.func @transform_0(%arg0: i32) -> (i32, i32) {
    %c0_i32 = arith.constant 0 : i32
    %c0_i32_0 = arith.constant 0 : i32
    return %arg0, %c0_i32 : i32, i32
  }
  func.func @transform_1(%arg0: i32) -> (i32, i32) {
    %c0_i32 = arith.constant 0 : i32
    %c0_i32_0 = arith.constant 0 : i32
    %c0_i32_1 = arith.constant 0 : i32
    return %c0_i32, %c0_i32_0 : i32, i32
  }
  func.func @transform_2(%arg0: i32) -> (i32, i32) {
    %c0_i32 = arith.constant 0 : i32
    %c0_i32_0 = arith.constant 0 : i32
    %c0_i32_1 = arith.constant 0 : i32
    return %c0_i32, %c0_i32_0 : i32, i32
  }
  func.func @transform_3(%arg0: i32) -> (i32, i32) {
    %c0_i32 = arith.constant 0 : i32
    %c0_i32_0 = arith.constant 0 : i32
    %c0_i32_1 = arith.constant 0 : i32
    return %c0_i32, %c0_i32_0 : i32, i32
  }
  func.func @transform_4(%arg0: i32) -> (i32, i32) {
    %c0_i32 = arith.constant 0 : i32
    %c0_i32_0 = arith.constant 0 : i32
    %c0_i32_1 = arith.constant 0 : i32
    return %c0_i32, %c0_i32_0 : i32, i32
  }
  func.func @transform_5(%arg0: i32) -> (i32, i32) {
    %c0_i32 = arith.constant 0 : i32
    %c0_i32_0 = arith.constant 0 : i32
    %c0_i32_1 = arith.constant 0 : i32
    return %c0_i32, %c0_i32_0 : i32, i32
  }
  func.func @transform_6(%arg0: i32) -> (i32, i32) {
    %c0_i32 = arith.constant 0 : i32
    %c0_i32_0 = arith.constant 0 : i32
    %c0_i32_1 = arith.constant 0 : i32
    return %c0_i32, %c0_i32_0 : i32, i32
  }
  func.func @transform_7(%arg0: i32) -> (i32, i32) {
    %c0_i32 = arith.constant 0 : i32
    %c0_i32_0 = arith.constant 0 : i32
    return %arg0, %c0_i32 : i32, i32
  }
}

</mosaic_0001>

<bundles_post_ra>
// kernel: dqn_forward.1
= control target key start
LH: loop header
LB: loop body
LE: loop exit
PB: predicated region body
PF: predicated region fallthrough
CT: control target
= control target key end

     0   :  { %12 = vsyncpa [#allocation3], 0  ;;  %s893_s0 = inlined_call_operand.hbm [shape: bf16[8,8], index: 0, kind: input, shape index: {}]   ;;  %s894_s1 = inlined_call_operand.hbm [shape: bf16[8,128], index: 1, kind: input, shape index: {}]   ;;  %s895_s2 = inlined_call_operand.hbm [shape: f32[1,128], index: 2, kind: input, shape index: {}]   ;;  %s896_s3 = inlined_call_operand.hbm [shape: bf16[128,128], index: 3, kind: input, shape index: {}]   ;;  %s897_s4 = inlined_call_operand.hbm [shape: f32[1,128], index: 4, kind: input, shape index: {}]   ;;  %s898_s5 = inlined_call_operand.hbm [shape: bf16[128,128], index: 5, kind: input, shape index: {}]   ;;  %s899_s6 = inlined_call_operand.hbm [shape: f32[1,128], index: 6, kind: input, shape index: {}]   ;;  %s900_s7 = inlined_call_operand.hbm [shape: f32[8,128], index: 7, kind: output, shape index: {}]  }
   0x1   :  { %13 = vsyncpa [#allocation6], 0 }
   0x2   :  { %14 = vsyncpa [#allocation9], 0 }
   0x3   :  { %15 = vsyncpa [#allocation12], 0 }
   0x4   :  { %16 = vsyncpa [#allocation4], 0  ;;  %s715_s24 = smov [#allocation5]   ;;  %s716_s26 = smov [#allocation8]  }
   0x5   :  { %s33_s25 = sshll.u32 %s715_s24, 4  ;;  %s52_s27 = sshll.u32 %s716_s26, 4  ;;  %s34_s25 = int_to_ptr.vmem [resolvable:$true] %s33_s25  ;;  %s767_s27 = int_to_ptr.vmem [resolvable:$true] %s52_s27 }
   0x6   :  { %s529_s30 = scalar_lea.hbm %s894_s1, 64 }
   0x7   :  { %p530_p0 = scmp.ne.s32.totalorder %s894_s1, %s529_s30  ;;  %p533_p1 = scmp.lt.u32.totalorder %s529_s30, %s894_s1 }
   0x9   :  { %p535_p2 = pnand %p533_p1, %p530_p0 }
   0xb   :  { %538 = shalt.err (!%p535_p2)
}
   0xc   :  { %s539_s12 = scalar_lea.vmem %s34_s25, 64  ;;  %p544_p4 = scmp.lt.s32.totalorder %s34_s25, %s34_s25 }
   0xd   :  { %p540_p3 = scmp.ne.s32.totalorder %s34_s25, %s539_s12  ;;  %p545_p5 = scmp.lt.s32.totalorder %s539_s12, %s539_s12 }
   0xf   :  { %p546_p6 = por %p545_p5, %p544_p4 }
  0x11   :  { %p547_p7 = pnand %p546_p6, %p540_p3 }
  0x13   :  { %550 = shalt.err (!%p547_p7)
}
  0x14   :  { %36 = dma.hbm_to_vmem [thread:$0]  %s894_s1, 64, %s34_s25, [#allocation6]  }
  0x15   :  { %s551_s17 = scalar_lea.hbm %s896_s3, 1024 }
  0x16   :  { %p552_p8 = scmp.ne.s32.totalorder %s896_s3, %s551_s17  ;;  %p555_p9 = scmp.lt.u32.totalorder %s551_s17, %s896_s3 }
  0x18   :  { %p557_p10 = pnand %p555_p9, %p552_p8 }
  0x1a   :  { %560 = shalt.err (!%p557_p10)
}
  0x1b   :  { %s561_s22 = scalar_lea.vmem %s767_s27, 1024  ;;  %p566_p12 = scmp.lt.s32.totalorder %s767_s27, %s767_s27 }
  0x1c   :  { %p562_p11 = scmp.ne.s32.totalorder %s767_s27, %s561_s22  ;;  %p567_p13 = scmp.lt.s32.totalorder %s561_s22, %s561_s22 }
  0x1e   :  { %p568_p0 = por %p567_p13, %p566_p12 }
  0x20   :  { %p569_p1 = pnand %p568_p0, %p562_p11 }
  0x22   :  { %572 = shalt.err (!%p569_p1)
}
  0x23   :  { %s717_s1 = smov 64   ;;  %s718_s23 = smov 4  }
  0x24   :  { %58 = dma.hbm_to_vmem [thread:$0]  %s896_s3, 1024, %s767_s27, [#allocation9], %s717_s1, %s717_s1, %s718_s23  }
  0x25   :  { %s719_s26 = smov [#allocation11]   ;;  %s720_s29 = smov [#allocation2]  }
  0x26   :  { %s74_s28 = sshll.u32 %s719_s26, 4  ;;  %s23_s30 = sshll.u32 %s720_s29, 4  ;;  %s75_s28 = int_to_ptr.vmem [resolvable:$true] %s74_s28  ;;  %s24_s30 = int_to_ptr.vmem [resolvable:$true] %s23_s30 }
  0x27   :  { %s573_s10 = scalar_lea.hbm %s898_s5, 1024 }
  0x28   :  { %p574_p2 = scmp.ne.s32.totalorder %s898_s5, %s573_s10  ;;  %p577_p3 = scmp.lt.u32.totalorder %s573_s10, %s898_s5 }
  0x2a   :  { %p579_p4 = pnand %p577_p3, %p574_p2 }
  0x2c   :  { %582 = shalt.err (!%p579_p4)
}
  0x2d   :  { %s583_s3 = scalar_lea.vmem %s75_s28, 1024  ;;  %p588_p6 = scmp.lt.s32.totalorder %s75_s28, %s75_s28 }
  0x2e   :  { %p584_p5 = scmp.ne.s32.totalorder %s75_s28, %s583_s3  ;;  %p589_p7 = scmp.lt.s32.totalorder %s583_s3, %s583_s3 }
  0x30   :  { %p590_p8 = por %p589_p7, %p588_p6 }
  0x32   :  { %p591_p9 = pnand %p590_p8, %p584_p5 }
  0x34   :  { %594 = shalt.err (!%p591_p9)
}
  0x35   :  { %80 = dma.hbm_to_vmem [thread:$0]  %s898_s5, 1024, %s75_s28, [#allocation12], %s717_s1, %s717_s1, %s718_s23  }
  0x36   :  { %s595_s18 = scalar_lea.hbm %s893_s0, 64 }
  0x37   :  { %p596_p10 = scmp.ne.s32.totalorder %s893_s0, %s595_s18  ;;  %p599_p11 = scmp.lt.u32.totalorder %s595_s18, %s893_s0 }
  0x39   :  { %p601_p12 = pnand %p599_p11, %p596_p10 }
  0x3b   :  { %604 = shalt.err (!%p601_p12)
}
  0x3c   :  { %s605_s24 = scalar_lea.vmem %s24_s30, 64  ;;  %p610_p0 = scmp.lt.s32.totalorder %s24_s30, %s24_s30 }
  0x3d   :  { %p606_p13 = scmp.ne.s32.totalorder %s24_s30, %s605_s24  ;;  %p611_p1 = scmp.lt.s32.totalorder %s605_s24, %s605_s24 }
  0x3f   :  { %p612_p2 = por %p611_p1, %p610_p0 }
  0x41   :  { %p613_p3 = pnand %p612_p2, %p606_p13 }
  0x43   :  { %616 = shalt.err (!%p613_p3)
}
  0x44   :  { %26 = dma.hbm_to_vmem [thread:$0]  %s893_s0, 64, %s24_s30, [#allocation3]  }
  0x45   :  { %s721_s23 = smov [#allocation7]   ;;  %s722_s26 = smov [#allocation10]  }
  0x46   :  { %s43_s25 = sshll.u32 %s721_s23, 4  ;;  %s65_s28 = sshll.u32 %s722_s26, 4  ;;  %s44_s25 = int_to_ptr.vmem [resolvable:$true] %s43_s25  ;;  %s66_s28 = int_to_ptr.vmem [resolvable:$true] %s65_s28 }
  0x47   :  { %s617_s9 = scalar_lea.hbm %s895_s2, 16 }
  0x48   :  { %p618_p4 = scmp.ne.s32.totalorder %s895_s2, %s617_s9  ;;  %p621_p5 = scmp.lt.u32.totalorder %s617_s9, %s895_s2 }
  0x4a   :  { %p623_p6 = pnand %p621_p5, %p618_p4 }
  0x4c   :  { %626 = shalt.err (!%p623_p6)
}
  0x4d   :  { %s627_s0 = scalar_lea.vmem %s44_s25, 16  ;;  %s631_s30 = scalar_lea.vmem %s44_s25, 32 }
  0x4e   :  { %p628_p7 = scmp.ne.s32.totalorder %s44_s25, %s627_s0  ;;  %p632_p8 = scmp.lt.s32.totalorder %s44_s25, %s44_s25 }
  0x4f   :  { %p633_p9 = scmp.lt.s32.totalorder %s631_s30, %s627_s0 }
  0x51   :  { %p634_p10 = por %p633_p9, %p632_p8 }
  0x53   :  { %p635_p11 = pnand %p634_p10, %p628_p7 }
  0x55   :  { %638 = shalt.err (!%p635_p11)
}
  0x56   :  { %46 = dma.hbm_to_vmem [thread:$0]  %s895_s2, 16, %s44_s25, [#allocation6]  }
  0x57   :  { %s639_s16 = scalar_lea.hbm %s897_s4, 16 }
  0x58   :  { %p640_p12 = scmp.ne.s32.totalorder %s897_s4, %s639_s16  ;;  %p643_p13 = scmp.lt.u32.totalorder %s639_s16, %s897_s4 }
  0x5a   :  { %p645_p0 = pnand %p643_p13, %p640_p12 }
  0x5c   :  { %648 = shalt.err (!%p645_p0)
}
  0x5d   :  { %s649_s21 = scalar_lea.vmem %s66_s28, 16  ;;  %s653_s22 = scalar_lea.vmem %s66_s28, 32 }
  0x5e   :  { %p650_p1 = scmp.ne.s32.totalorder %s66_s28, %s649_s21  ;;  %p654_p2 = scmp.lt.s32.totalorder %s66_s28, %s66_s28 }
  0x5f   :  { %p655_p3 = scmp.lt.s32.totalorder %s653_s22, %s649_s21 }
  0x61   :  { %p656_p4 = por %p655_p3, %p654_p2 }
  0x63   :  { %p657_p5 = pnand %p656_p4, %p650_p1 }
  0x65   :  { %660 = shalt.err (!%p657_p5)
}
  0x66   :  { %68 = dma.hbm_to_vmem [thread:$0]  %s897_s4, 16, %s66_s28, [#allocation9]  }
  0x67   :  { %s723_s5 = smov [#allocation13]   ;;  %s661_s26 = scalar_lea.hbm %s899_s6, 16 }
  0x68   :  { %s87_s1 = sshll.u32 %s723_s5, 4  ;;  %p662_p6 = scmp.ne.s32.totalorder %s899_s6, %s661_s26  ;;  %s88_s1 = int_to_ptr.vmem [resolvable:$true] %s87_s1 }
  0x69   :  { %p665_p7 = scmp.lt.u32.totalorder %s661_s26, %s899_s6 }
  0x6b   :  { %p667_p8 = pnand %p665_p7, %p662_p6 }
  0x6d   :  { %670 = shalt.err (!%p667_p8)
}
  0x6e   :  { %s671_s11 = scalar_lea.vmem %s88_s1, 16  ;;  %s675_s4 = scalar_lea.vmem %s88_s1, 32 }
  0x6f   :  { %p672_p9 = scmp.ne.s32.totalorder %s88_s1, %s671_s11  ;;  %p676_p10 = scmp.lt.s32.totalorder %s88_s1, %s88_s1 }
  0x70   :  { %p677_p11 = scmp.lt.s32.totalorder %s675_s4, %s671_s11 }
  0x72   :  { %p678_p12 = por %p677_p11, %p676_p10 }
  0x74   :  { %p679_p13 = pnand %p678_p12, %p672_p9 }
  0x76   :  { %682 = shalt.err (!%p679_p13)
}
  0x77   :  { %90 = dma.hbm_to_vmem [thread:$0]  %s899_s6, 16, %s88_s1, [#allocation12]  }
  0x78   :  { %705 = dma.done.wait [#allocation3], 64  }
  0x79   :  { %706 = vsyncadd [#allocation3], 4294967232 }
  0x7a   :  { %707 = dma.done.wait [#allocation6], 80  }
  0x7b   :  { %708 = vsyncadd [#allocation6], 4294967216 }
  0x7c   :  { %709 = dma.done.wait [#allocation9], 1040  }
  0x7d   :  { %710 = vsyncadd [#allocation9], 4294966256 }
  0x7e   :  { %711 = dma.done.wait [#allocation12], 1040  }
  0x7f   :  { %712 = vsyncadd [#allocation12], 4294966256  ;;  %v724_v0 = vmov 0.0   ;;  %vm725_vm0 = vmmov 0   ;;  %vm126_vm1 = vcmask 1043456   ;;  %vm122_vm2 = vcmask 64512  }
  0x80   :  { %455 = vmatprep.subr.bf16.mxu0 %v724_v0  ;;  %457 = vmatprep.mubr.msk.bf16.mxu0 %vm725_vm0, %v724_v0  ;;  %v114_v1 = vld [vmem:[#allocation5] sm:$0xf]  ;;  %v513_v3 = vld [vmem:[#allocation8] sm:$0xff]   ;;  %v113_v4 = vld [vmem:[#allocation2] sm:$0xf]  ;;  %s726_s6 = smov [#allocation14]  }
  0x81   :  { %461 = vmatprep.subr.bf16.mxu1 %v724_v0  ;;  %477 = vmatprep.mubr.msk.bf16.mxu1 %vm725_vm0, %v724_v0  ;;  %v128_v2 = vsel %vm126_vm1, %v114_v1, 0  ;;  %v514_v5 = vld [vmem:[#allocation8 + $0x8] sm:$0xff]   ;;  %v515_v6 = vld [vmem:[#allocation8 + $0x10] sm:$0xff]   ;;  %v516_v7 = vld [vmem:[#allocation8 + $0x18] sm:$0xff]   ;;  %s403_s13 = sshll.u32 %s726_s6, 4  ;;  %s404_s13 = int_to_ptr.vmem [resolvable:$true] %s403_s13 }
  0x82   :  { %456 = vmatpush3.bf16.msra.mxu0 %v128_v2  ;;  %462 = vmatpush3.bf16.msra.mxu1 %v513_v3  ;;  %v517_v8 = vld [vmem:[#allocation8 + $0x20] sm:$0xff]   ;;  %v518_v9 = vld [vmem:[#allocation8 + $0x28] sm:$0xff]   ;;  %v519_v10 = vld [vmem:[#allocation8 + $0x30] sm:$0xff]   ;;  %s683_s0 = scalar_lea.vmem %s404_s13, 128  ;;  %p688_p1 = scmp.lt.s32.totalorder %s404_s13, %s404_s13 }
  0x83   :  { %481 = vmatprep.subr.bf16.mxu0 %v724_v0  ;;  %463 = vmatprep.subr.bf16.mxu1 %v724_v0  ;;  %v520_v11 = vld [vmem:[#allocation8 + $0x38] sm:$0xff]   ;;  %v521_v12 = vld [vmem:[#allocation11] sm:$0xff]   ;;  %v522_v13 = vld [vmem:[#allocation11 + $0x8] sm:$0xff]   ;;  %p684_p0 = scmp.ne.s32.totalorder %s404_s13, %s683_s0  ;;  %p689_p2 = scmp.lt.s32.totalorder %s683_s0, %s683_s0 }
  0x84   :  { %v523_v14 = vld [vmem:[#allocation11 + $0x10] sm:$0xff]   ;;  %v524_v15 = vld [vmem:[#allocation11 + $0x18] sm:$0xff]   ;;  %v525_v16 = vld [vmem:[#allocation11 + $0x20] sm:$0xff]  }
  0x85   :  { %458 = vmatmul.mubr.msk.bf16.vlgmr.msra.gmra.mrb[0].mxu0 %vm122_vm2, %v113_v4  ;;  %v526_v17 = vld [vmem:[#allocation11 + $0x28] sm:$0xff]   ;;  %v415_v18 = vld [vmem:[#allocation7] ss:$0 sm:$0xff]  ;;  %v527_v26 = vld [vmem:[#allocation11 + $0x30] sm:$0xff]   ;;  %p690_p3 = por %p689_p2, %p688_p1 }
  0x86   :  { %497 = vmatprep.mubr.msk.bf16.mxu0 %vm725_vm0, %v724_v0  ;;  %464 = vmatpush3.bf16.msra.mxu1 %v514_v5  ;;  %v528_v27 = vld [vmem:[#allocation11 + $0x38] sm:$0xff]   ;;  %v426_v36 = vld [vmem:[#allocation13] ss:$0 sm:$0xff] }
  0x87   :  { %465 = vmatprep.subr.bf16.mxu1 %v724_v0  ;;  %482 = vmatpush3.bf16.msra.mxu0 %v521_v12  ;;  %v417_v28 = vld [vmem:[#allocation10] ss:$0 sm:$0xff]  ;;  %p691_p4 = pnand %p690_p3, %p684_p0 }
  0x88   :  { %483 = vmatprep.subr.bf16.mxu0 %v724_v0 }
  0x8a   :  { %466 = vmatpush3.bf16.msra.mxu1 %v515_v6 }
  0x8b   :  { %467 = vmatprep.subr.bf16.mxu1 %v724_v0  ;;  %484 = vmatpush3.bf16.msra.mxu0 %v522_v13 }
  0x8c   :  { %485 = vmatprep.subr.bf16.mxu0 %v724_v0 }
  0x8e   :  { %468 = vmatpush3.bf16.msra.mxu1 %v516_v7 }
  0x8f   :  { %469 = vmatprep.subr.bf16.mxu1 %v724_v0  ;;  %486 = vmatpush3.bf16.msra.mxu0 %v523_v14 }
  0x90   :  { %487 = vmatprep.subr.bf16.mxu0 %v724_v0 }
  0x92   :  { %470 = vmatpush3.bf16.msra.mxu1 %v517_v8 }
  0x93   :  { %471 = vmatprep.subr.bf16.mxu1 %v724_v0  ;;  %488 = vmatpush3.bf16.msra.mxu0 %v524_v15 }
  0x94   :  { %489 = vmatprep.subr.bf16.mxu0 %v724_v0 }
  0x96   :  { %472 = vmatpush3.bf16.msra.mxu1 %v518_v9 }
  0x97   :  { %473 = vmatprep.subr.bf16.mxu1 %v724_v0  ;;  %490 = vmatpush3.bf16.msra.mxu0 %v525_v16 }
  0x98   :  { %491 = vmatprep.subr.bf16.mxu0 %v724_v0 }
  0x9a   :  { %474 = vmatpush3.bf16.msra.mxu1 %v519_v10 }
  0x9b   :  { %475 = vmatprep.subr.bf16.mxu1 %v724_v0  ;;  %492 = vmatpush3.bf16.msra.mxu0 %v526_v17 }
  0x9c   :  { %493 = vmatprep.subr.bf16.mxu0 %v724_v0 }
  0x9e   :  { %476 = vmatpush3.bf16.msra.mxu1 %v520_v11 }
  0x9f   :  { %494 = vmatpush3.bf16.msra.mxu0 %v527_v26 }
  0xa0   :  { %495 = vmatprep.subr.bf16.mxu0 %v724_v0 }
  0xa3   :  { %496 = vmatpush3.bf16.msra.mxu0 %v528_v27 }
 0x158   :  { %v164_v19 = vpop.f32.mrb[0].mxu0 }
 0x159   :  { %v165_v20 = vadd.f32 %v415_v18, %v164_v19  ;;  %v459_v21 = vpop.f32.mrb[1].mxu0 }
 0x15a   :  { %v167_v22 = vpop.f32.mrb[2].mxu0 }
 0x15b   :  { %v170_v23 = vmax.f32 %v165_v20, 0.0  ;;  %v460_v24 = vpop.f32.mrb[3].mxu0 }
 0x15d   :  { %v171_v25 = vpack.c.bf16 %v170_v23, %v170_v23 }
 0x15f   :  { %478 = vmatmul.mubr.bf16.vlgmr.msra.gmra.mrb[0].mxu1 %v171_v25 }
 0x232   :  { %v277_v29 = vpop.f32.mrb[0].mxu1 }
 0x233   :  { %v278_v30 = vadd.f32 %v417_v28, %v277_v29  ;;  %v479_v31 = vpop.f32.mrb[1].mxu1 }
 0x234   :  { %v280_v32 = vpop.f32.mrb[2].mxu1 }
 0x235   :  { %v283_v33 = vmax.f32 %v278_v30, 0.0  ;;  %v480_v34 = vpop.f32.mrb[3].mxu1 }
 0x237   :  { %v284_v35 = vpack.c.bf16 %v283_v33, %v283_v33 }
 0x239   :  { %498 = vmatmul.mubr.bf16.vlgmr.msra.gmra.mrb[4].mxu0 %v284_v35 }
 0x30c   :  { %v390_v37 = vpop.f32.mrb[4].mxu0 }
 0x30d   :  { %v391_v38 = vadd.f32 %v426_v36, %v390_v37  ;;  %v499_v39 = vpop.f32.mrb[5].mxu0 }
 0x30e   :  { %v393_v40 = vpop.f32.mrb[6].mxu0 }
 0x30f   :  { %396 = vst [vmem:[#allocation14] sm:$0xff] %v391_v38  ;;  %v500_v41 = vpop.f32.mrb[7].mxu0 }
 0x310   :  { %694 = shalt.err (!%p691_p4)
}
 0x311   :  { %s695_s3 = scalar_lea.hbm %s900_s7, 128 }
 0x312   :  { %p696_p5 = scmp.ne.s32.totalorder %s900_s7, %s695_s3  ;;  %p699_p6 = scmp.lt.u32.totalorder %s695_s3, %s900_s7 }
 0x314   :  { %p701_p7 = pnand %p699_p6, %p696_p5 }
 0x316   :  { %704 = shalt.err (!%p701_p7)
}
 0x317   :  { %406 = dma.vmem_to_hbm [thread:$0]  %s404_s13, 128, %s900_s7, [#allocation4]  }
 0x318   :  { %713 = dma.done.wait [#allocation4], 128  }
 0x319   :  { %714 = vsyncadd [#allocation4], 4294967168 }
 0x31a   :  { %410 = vsyncpa [#allocation3], 1 }
 0x31b   :  { %411 = vsyncpa [#allocation6], 1 }
 0x31c   :  { %412 = vsyncpa [#allocation9], 1 }
 0x31d   :  { %413 = vsyncpa [#allocation12], 1 }
 0x31e   :  { %414 = vsyncpa [#allocation4], 1 }

</bundles_post_ra>
